<compile_context>
chip_gen: v6e
topology: v6e:2x2x1
jax: 0.10.0
libtpu: 0.0.40
codegen_flags: <defaults>
</compile_context>

<pallas_src>
import math
import typing as tp

import jax
import jax.numpy as jnp
from jax.experimental import pallas as pl
from jax.experimental.pallas import tpu as pltpu


def _bulk_dma_copy_kernel(x_hbm_ref, o_hbm_ref, copy_sem):
    """Single bulk HBM -> HBM DMA of the (already target-shaped) array."""
    cp = pltpu.make_async_copy(x_hbm_ref, o_hbm_ref, copy_sem)
    cp.start()
    cp.wait()


def unflatten(_in: jax.Array, num_samples: int, shape: tp.Tuple[int, ...]) -> jax.Array:
    """Pallas equivalent of Unflatten.forward.

    Args:
      _in: array whose leading dim is the batch; total elements must equal
           bs * max(1, num_samples) * prod(shape).
      num_samples: static int.
      shape: static tuple of ints.
    Returns:
      Array of shape (bs, max(1, num_samples), *shape), same dtype as _in.
    """
    bs = int(_in.shape[0])
    ns = max(1, int(num_samples))
    out_shape = (bs, ns) + tuple(int(s) for s in shape)

    total_elems = int(math.prod(out_shape))
    assert int(math.prod(_in.shape)) == total_elems, (
        f"cannot reshape {_in.shape} to {out_shape}"
    )

    # Metadata-only glue: present data already in the target shape so the DMA
    # src/dst refs match and no post-kernel reshape is needed.
    x = _in.reshape(out_shape)

    itemsize = jnp.dtype(_in.dtype).itemsize
    bytes_moved = 2 * total_elems * itemsize  # one HBM read + one HBM write

    return pl.pallas_call(
        _bulk_dma_copy_kernel,
        out_shape=jax.ShapeDtypeStruct(out_shape, _in.dtype),
        # Keep both operands in HBM: no VMEM staging, no (8,128) tiling
        # constraints, works for arbitrarily large inputs on v5e / v6e / v7x.
        in_specs=[pl.BlockSpec(memory_space=pl.ANY)],
        out_specs=pl.BlockSpec(memory_space=pl.ANY),
        scratch_shapes=[pltpu.SemaphoreType.DMA],
        # Advisory hint for XLA's scheduler: pure mem-bound op, zero compute.
        cost_estimate=pl.CostEstimate(
            flops=0, transcendentals=0, bytes_accessed=bytes_moved
        ),
    )(x)


if __name__ == "__main__":
    key = jax.random.PRNGKey(0)

    # Small example consistent with the module: batch=2, num_samples=4,
    # per-sample shape (4, 16)  ->  input (2, 4*4*16) = (2, 256).
    bs = 2
    num_samples = 4
    shape = (4, 16)
    flat = max(1, num_samples) * math.prod(shape)

    x = jax.random.normal(key, (bs, flat), dtype=jnp.float32)

    out = unflatten(x, num_samples, shape)
    out = jax.block_until_ready(out)

    # Correctness check against plain reshape semantics (torch-equivalent).
    expected = x.reshape((bs, max(1, num_samples)) + shape)
    assert out.shape == (bs, max(1, num_samples)) + shape, out.shape
    assert out.dtype == x.dtype
    assert bool(jnp.array_equal(out, expected))

    # Also exercise the num_samples <= 0 branch (max(1, num_samples) == 1).
    x1 = jax.random.normal(key, (bs, math.prod(shape)), dtype=jnp.float32)
    out1 = jax.block_until_ready(unflatten(x1, 0, shape))
    assert out1.shape == (bs, 1) + shape
    assert bool(jnp.array_equal(out1, x1.reshape((bs, 1) + shape)))

    # Non-float dtype + odd (non-128-aligned) trailing shape also works since
    # nothing is tiled through VMEM.
    x2 = jax.random.randint(key, (bs, 3 * 5 * 7), minval=-10, maxval=10, dtype=jnp.int32)
    out2 = jax.block_until_ready(unflatten(x2, 3, (5, 7)))
    assert out2.shape == (bs, 3, 5, 7)
    assert bool(jnp.array_equal(out2, x2.reshape((bs, 3, 5, 7))))

    print("KERNEL_OK")
</pallas_src>

<mosaic_0001>
module attributes {stable_mosaic.version = 11 : i64} {
  func.func @_bulk_dma_copy_kernel(%arg0: memref<2x4x4x16xf32, #tpu.memory_space<any>>, %arg1: memref<2x4x4x16xf32, #tpu.memory_space<any>>, %arg2: memref<!tpu.dma_semaphore, #tpu.memory_space<semaphore_mem>>) attributes {dimension_semantics = [], scalar_prefetch = 0 : i64, scratch_operands = 1 : i64, tpu.core_type = #tpu.core_type<tc>} {
    tpu.enqueue_dma source(%arg0 : memref<2x4x4x16xf32, #tpu.memory_space<any>>) target(%arg1 : memref<2x4x4x16xf32, #tpu.memory_space<any>>) target_semaphore(%arg2 : memref<!tpu.dma_semaphore, #tpu.memory_space<semaphore_mem>>)
    tpu.wait_dma2 semaphore(%arg2 : memref<!tpu.dma_semaphore, #tpu.memory_space<semaphore_mem>>) src(%arg0 : memref<2x4x4x16xf32, #tpu.memory_space<any>>) dst(%arg1 : memref<2x4x4x16xf32, #tpu.memory_space<any>>)
    return
  }
}

</mosaic_0001>

<bundles_post_ra>
// kernel: tpu_custom_call.1
= control target key start
LH: loop header
LB: loop body
LE: loop exit
PB: predicated region body
PF: predicated region fallthrough
CT: control target
= control target key end

     0   :  { %s30_s6 = smov [#allocation2]   ;;  %s31_s7 = smov 131072   ;;  %s49_s0 = inlined_call_operand.hbm [shape: f32[2,4,4,16], index: 0, kind: input, shape index: {}]   ;;  %s50_s1 = inlined_call_operand.hbm [shape: f32[2,4,4,16], index: 1, kind: output, shape index: {}]  }
   0x1   :  { %s32_s8 = smov 0  }
   0x2   :  { %12 = dma.general %s49_s0, 512, %s50_s1, %s30_s6, %s31_s7, [#allocation4], %s32_s8, 0  }
   0x3   :  { %28 = dma.done.wait [#allocation2], 512 }
   0x4   :  { %29 = vsyncadd [#allocation2], 4294966784 }
   0x5   :  { %18 = vsyncmov [#allocation2] }
   0x8   :  { %s19_s13 = vpop.sfrf %18 }
   0x9   :  { %p24_p0 = scmp.ne.s32.totalorder %s19_s13, 0 }
   0xb   :  { %23 = shalt.err (%p24_p0)  }

</bundles_post_ra>
